<compile_context>
chip_gen: v5e
topology: v5e:2x2
jax: 0.10.0
libtpu: 0.0.40
codegen_flags: <defaults>
</compile_context>

<pallas_src>
import functools

import jax
import jax.numpy as jnp
from jax.experimental import pallas as pl
from jax.experimental.pallas import tpu as pltpu

# small stand-in sizes (real model: 224x224 input, patch 16, D=512)
RES = 32                    # input resolution fed to the "CLIP" visual encoder
PATCH = 8                   # patch size
N_PATCH = (RES // PATCH) ** 2
PDIM_IMG = 3 * PATCH * PATCH        # 192
PDIM_ALPHA = PATCH * PATCH          # 64
D = 32                      # embedding dimension
D_TXT = 32                  # pooled text-token embedding width

# padded / tiled kernel layout (lane-dense)
MB = 8                      # masks per grid step (sublane tile)
K_PAD = 128                 # padded alpha-patch (contraction) dim
D_PAD = 128                 # padded embedding dim
W_PAD = 128                 # padded word count (lane-dense similarity output)


# ---------------------------------------------------------------------------
# Fused kernel: alpha-conditioned visual encode + text projection + CLIP similarity
# one grid step handles MB masks end-to-end
# ---------------------------------------------------------------------------
def _clip_fused_kernel(ap_ref, base_ref, wa_ref, wp_ref, txt_ref, wt_ref, o_ref,
                       *, n_words):
    # visual encode: pooled alpha patches @ W_alpha, image branch pre-hoisted into base_ref
    tok = jnp.dot(ap_ref[...], wa_ref[...], preferred_element_type=jnp.float32)
    tok = tok + base_ref[...]                                              # [MB, D_PAD]
    img = jnp.dot(tok, wp_ref[...], preferred_element_type=jnp.float32)   # [MB, D_PAD]

    # text projection
    txt = jnp.dot(txt_ref[...], wt_ref[...], preferred_element_type=jnp.float32)  # [W_PAD, D_PAD]

    # L2 normalize (rsqrt -> EUP); guard zero-padded rows
    img = img * jax.lax.rsqrt(jnp.maximum(jnp.sum(img * img, axis=-1, keepdims=True), 1e-12))
    txt = txt * jax.lax.rsqrt(jnp.maximum(jnp.sum(txt * txt, axis=-1, keepdims=True), 1e-12))

    # logits = 100 * img @ txt.T without an explicit transpose
    logits = 100.0 * jax.lax.dot_general(
        img, txt, dimension_numbers=(((1,), (1,)), ((), ())),
        preferred_element_type=jnp.float32)                                # [MB, W_PAD]

    # softmax over the valid words only (mask out zero-padded columns)
    col = jax.lax.broadcasted_iota(jnp.int32, logits.shape, 1)
    logits = jnp.where(col < n_words, logits, -1e30)
    m = jnp.max(logits, axis=-1, keepdims=True)
    e = jnp.exp(logits - m)
    denom = jnp.sum(e, axis=-1, keepdims=True)
    o_ref[...] = e * pl.reciprocal(denom, approx=True)


def clip_fused(alpha_pooled, base_tok, w_alpha_p, w_proj_p, txt_pooled_p, w_txt_p, n_words):
    m_pad = alpha_pooled.shape[0]
    kernel = functools.partial(_clip_fused_kernel, n_words=n_words)
    return pl.pallas_call(
        kernel,
        out_shape=jax.ShapeDtypeStruct((m_pad, W_PAD), jnp.float32),
        grid=(m_pad // MB,),
        in_specs=[
            pl.BlockSpec((MB, K_PAD), lambda i: (i, 0)),       # pooled alpha patches per mask
            pl.BlockSpec((1, D_PAD), lambda i: (0, 0)),        # hoisted image-branch token
            pl.BlockSpec((K_PAD, D_PAD), lambda i: (0, 0)),    # W_alpha (padded)
            pl.BlockSpec((D_PAD, D_PAD), lambda i: (0, 0)),    # W_proj (padded)
            pl.BlockSpec((W_PAD, D_PAD), lambda i: (0, 0)),    # pooled text tokens (padded)
            pl.BlockSpec((D_PAD, D_PAD), lambda i: (0, 0)),    # W_txt (padded)
        ],
        out_specs=pl.BlockSpec((MB, W_PAD), lambda i: (i, 0)),
        compiler_params=pltpu.CompilerParams(
            dimension_semantics=("parallel",)),                # mask tiles shard across TCs on v7x
    )(alpha_pooled, base_tok, w_alpha_p, w_proj_p, txt_pooled_p, w_txt_p)


# ---------------------------------------------------------------------------
# Glue (plain JAX): preprocessing, patchification, padding
# ---------------------------------------------------------------------------
def patchify(x, patch):
    # x: [C, H, W] -> [num_patches, C*patch*patch]
    C, H, W = x.shape
    x = x.reshape(C, H // patch, patch, W // patch, patch)
    x = jnp.transpose(x, (1, 3, 0, 2, 4))
    return x.reshape((H // patch) * (W // patch), C * patch * patch)


def _pad_to(x, shape):
    pads = [(0, t - s) for s, t in zip(x.shape, shape)]
    return jnp.pad(x, pads)


def _clip_core(image, masks, words_token_ids, params):
    w_img, w_alpha, w_proj, tok_embed, w_txt = params
    M = masks.shape[0]
    n_words = words_token_ids.shape[0]
    hp = jax.lax.Precision.HIGHEST

    # --- text "encoder" stand-in: pooled token embeddings (projection done in the kernel)
    txt_pooled = jnp.mean(tok_embed[words_token_ids], axis=1)              # [W, D_TXT]

    # --- visual preprocess (CLIP normalize) + patchify; mask-invariant, computed once
    mean = jnp.array([0.48145466, 0.4578275, 0.40821073], jnp.float32).reshape(3, 1, 1)
    std = jnp.array([0.26862954, 0.26130258, 0.27577711], jnp.float32).reshape(3, 1, 1)
    p_img = patchify((image - mean) / std, PATCH)                          # [N_PATCH, PDIM_IMG]
    base_tok = jnp.dot(jnp.mean(p_img, axis=0, keepdims=True), w_img,
                       precision=hp)                                       # [1, D] (hoisted)

    # --- per-mask preprocessing, vmapped (no Python loop of XLA graphs)
    def prep(mask):
        # mask_transform: ToTensor((mask*255).uint8) -> [0,1]; Resize(RES,RES); Normalize(0.5,0.26)
        m01 = (mask * 255.0).astype(jnp.uint8).astype(jnp.float32) / 255.0
        resized = jax.image.resize(m01, (RES, RES), method="bilinear")
        alpha = (resized - 0.5) * (1.0 / 0.26)
        pooled = jnp.mean(patchify(alpha[None], PATCH), axis=0)            # [PDIM_ALPHA]
        return alpha, pooled

    alphas, alpha_pooled = jax.vmap(prep)(masks)        # [M, RES, RES], [M, PDIM_ALPHA]

    # --- pad everything to lane-dense shapes and launch the single fused kernel
    m_pad = ((M + MB - 1) // MB) * MB
    ap = _pad_to(alpha_pooled, (m_pad, K_PAD))
    bt = _pad_to(base_tok, (1, D_PAD))
    wa = _pad_to(w_alpha, (K_PAD, D_PAD))
    wp = _pad_to(w_proj, (D_PAD, D_PAD))
    tp = _pad_to(txt_pooled, (W_PAD, D_PAD))
    wt = _pad_to(w_txt, (D_PAD, D_PAD))

    sims_pad = clip_fused(ap, bt, wa, wp, tp, wt, n_words)                 # [m_pad, W_PAD]
    return sims_pad[:M, :n_words], alphas


_clip_core_jit = jax.jit(_clip_core)


def clip_forward(image, masks, words_token_ids, params):
    """Mirrors CLIP.forward(img, list_of_words, masks=...)."""
    sims, alphas = _clip_core_jit(image, masks, words_token_ids, params)
    new_masks = []
    for m in range(masks.shape[0]):
        new_masks.append({"segmentation": masks[m],
                          "similarity": sims[m:m + 1],
                          "alpha": alphas[m]})
    return new_masks


# ---------------------------------------------------------------------------
# Pure-JAX reference (original per-mask computation order) for a correctness check
# ---------------------------------------------------------------------------
def _reference_forward(image, masks, words_token_ids, params):
    w_img, w_alpha, w_proj, tok_embed, w_txt = params
    hp = jax.lax.Precision.HIGHEST
    mean = jnp.array([0.48145466, 0.4578275, 0.40821073], jnp.float32).reshape(3, 1, 1)
    std = jnp.array([0.26862954, 0.26130258, 0.27577711], jnp.float32).reshape(3, 1, 1)
    p_img = patchify((image - mean) / std, PATCH)
    txt = jnp.dot(jnp.mean(tok_embed[words_token_ids], axis=1), w_txt, precision=hp)
    txt = txt / jnp.linalg.norm(txt, axis=-1, keepdims=True)
    sims = []
    for m in range(masks.shape[0]):
        m01 = (masks[m] * 255.0).astype(jnp.uint8).astype(jnp.float32) / 255.0
        alpha = (jax.image.resize(m01, (RES, RES), method="bilinear") - 0.5) / 0.26
        p_a = patchify(alpha[None], PATCH)
        tok = jnp.dot(p_img, w_img, precision=hp) + jnp.dot(p_a, w_alpha, precision=hp)
        feat = jnp.dot(jnp.mean(tok, axis=0, keepdims=True), w_proj, precision=hp)
        feat = feat / jnp.linalg.norm(feat, axis=-1, keepdims=True)
        logits = 100.0 * jnp.dot(feat, txt.T, precision=hp)
        sims.append(jax.nn.softmax(logits, axis=-1)[0])
    return jnp.stack(sims, axis=0)


# TODO(synk): SAM automatic mask generation and the full pretrained Alpha-CLIP
# ViT / text transformer (checkpoint loads) have no clean Pallas equivalent;
# masks are provided explicitly and the encoders are small synthetic stand-ins.

if __name__ == "__main__":
    key = jax.random.PRNGKey(0)
    k_im, k_m, k_wi, k_wa, k_wp, k_emb, k_wt, k_tok = jax.random.split(key, 8)

    # deterministic synthetic parameters
    w_img = jax.random.normal(k_wi, (PDIM_IMG, D), jnp.float32) * 0.02
    w_alpha = jax.random.normal(k_wa, (PDIM_ALPHA, D), jnp.float32) * 0.02
    w_proj = jax.random.normal(k_wp, (D, D), jnp.float32) * 0.1
    tok_embed = jax.random.normal(k_emb, (16, D_TXT), jnp.float32) * 0.1
    w_txt = jax.random.normal(k_wt, (D_TXT, D), jnp.float32) * 0.1
    params = (w_img, w_alpha, w_proj, tok_embed, w_txt)

    # inputs: RGB image (CHW), 2 binary masks, 3 "words" of 4 tokens each
    image = jax.random.uniform(k_im, (3, RES, RES), jnp.float32)
    m0 = jnp.zeros((RES, RES), jnp.float32).at[: RES // 2].set(1.0)
    m1 = (jax.random.uniform(k_m, (RES, RES)) > 0.5).astype(jnp.float32)
    masks = jnp.stack([m0, m1], axis=0)
    words_token_ids = jax.random.randint(k_tok, (3, 4), 0, 16)

    out = clip_forward(image, masks, words_token_ids, params)
    for elt in out:
        jax.block_until_ready(elt["similarity"])
        jax.block_until_ready(elt["alpha"])

    s = jnp.concatenate([elt["similarity"] for elt in out], axis=0)
    ref = _reference_forward(image, masks, words_token_ids, params)

    # sanity: finite, softmax rows sum to 1, matches the un-refactored reference
    assert bool(jnp.all(jnp.isfinite(s)))
    assert jnp.allclose(jnp.sum(s, axis=-1), 1.0, atol=1e-2)
    assert jnp.allclose(s, ref, atol=2e-2)
    print("KERNEL_OK")
</pallas_src>

<mosaic_0001>
module attributes {stable_mosaic.version = 11 : i64} {
  func.func @_clip_fused_kernel(%arg0: i32, %arg1: memref<8x128xf32, #tpu.memory_space<vmem>>, %arg2: memref<1x128xf32, #tpu.memory_space<vmem>>, %arg3: memref<128x128xf32, #tpu.memory_space<vmem>>, %arg4: memref<128x128xf32, #tpu.memory_space<vmem>>, %arg5: memref<128x128xf32, #tpu.memory_space<vmem>>, %arg6: memref<128x128xf32, #tpu.memory_space<vmem>>, %arg7: memref<8x128xf32, #tpu.memory_space<vmem>>) attributes {dimension_semantics = [#tpu.dimension_semantics<parallel>], iteration_bounds = array<i64: 1>, scalar_prefetch = 0 : i64, scratch_operands = 0 : i64, tpu.core_type = #tpu.core_type<tc>, window_params = [{transform_indices = @transform_0, window_bounds = array<i64: 8, 128>}, {pipeline_mode = #tpu.pipeline_mode<synchronous>, transform_indices = @transform_1, window_bounds = array<i64: 1, 128>}, {pipeline_mode = #tpu.pipeline_mode<synchronous>, transform_indices = @transform_2, window_bounds = array<i64: 128, 128>}, {pipeline_mode = #tpu.pipeline_mode<synchronous>, transform_indices = @transform_3, window_bounds = array<i64: 128, 128>}, {pipeline_mode = #tpu.pipeline_mode<synchronous>, transform_indices = @transform_4, window_bounds = array<i64: 128, 128>}, {pipeline_mode = #tpu.pipeline_mode<synchronous>, transform_indices = @transform_5, window_bounds = array<i64: 128, 128>}, {transform_indices = @transform_6, window_bounds = array<i64: 8, 128>}]} {
    %c0 = arith.constant 0 : index
    %c0_0 = arith.constant 0 : index
    %0 = vector.load %arg1[%c0, %c0_0] : memref<8x128xf32, #tpu.memory_space<vmem>>, vector<8x128xf32>
    %c0_1 = arith.constant 0 : index
    %c0_2 = arith.constant 0 : index
    %1 = vector.load %arg3[%c0_1, %c0_2] : memref<128x128xf32, #tpu.memory_space<vmem>>, vector<128x128xf32>
    %cst = arith.constant dense<0.000000e+00> : vector<8x128xf32>
    %2 = tpu.matmul %0, %1, %cst {dimension_numbers = #tpu.dot_dimension_numbers<[1], [0], [0], [1], [0, 0, 1, 1], [], []>} : vector<8x128xf32>, vector<128x128xf32>, vector<8x128xf32> -> vector<8x128xf32>
    %c0_3 = arith.constant 0 : index
    %c0_4 = arith.constant 0 : index
    %3 = vector.load %arg2[%c0_3, %c0_4] : memref<1x128xf32, #tpu.memory_space<vmem>>, vector<1x128xf32>
    %4 = vector.broadcast %3 : vector<1x128xf32> to vector<8x128xf32>
    %5 = arith.addf %2, %4 : vector<8x128xf32>
    %c0_5 = arith.constant 0 : index
    %c0_6 = arith.constant 0 : index
    %6 = vector.load %arg4[%c0_5, %c0_6] : memref<128x128xf32, #tpu.memory_space<vmem>>, vector<128x128xf32>
    %cst_7 = arith.constant dense<0.000000e+00> : vector<8x128xf32>
    %7 = tpu.matmul %5, %6, %cst_7 {dimension_numbers = #tpu.dot_dimension_numbers<[1], [0], [0], [1], [0, 0, 1, 1], [], []>} : vector<8x128xf32>, vector<128x128xf32>, vector<8x128xf32> -> vector<8x128xf32>
    %c0_8 = arith.constant 0 : index
    %c0_9 = arith.constant 0 : index
    %8 = vector.load %arg5[%c0_8, %c0_9] : memref<128x128xf32, #tpu.memory_space<vmem>>, vector<128x128xf32>
    %c0_10 = arith.constant 0 : index
    %c0_11 = arith.constant 0 : index
    %9 = vector.load %arg6[%c0_10, %c0_11] : memref<128x128xf32, #tpu.memory_space<vmem>>, vector<128x128xf32>
    %cst_12 = arith.constant dense<0.000000e+00> : vector<128x128xf32>
    %10 = tpu.matmul %8, %9, %cst_12 {dimension_numbers = #tpu.dot_dimension_numbers<[1], [0], [0], [1], [0, 0, 1, 1], [], []>} : vector<128x128xf32>, vector<128x128xf32>, vector<128x128xf32> -> vector<128x128xf32>
    %11 = arith.mulf %7, %7 : vector<8x128xf32>
    %cst_13 = arith.constant dense<0.000000e+00> : vector<8xf32>
    %12 = vector.multi_reduction <add>, %11, %cst_13 [1] : vector<8x128xf32> to vector<8xf32>
    %13 = vector.shape_cast %12 : vector<8xf32> to vector<8x1xf32>
    %cst_14 = arith.constant 9.99999996E-13 : f32
    %14 = vector.broadcast %cst_14 : f32 to vector<8x1xf32>
    %15 = arith.maximumf %13, %14 : vector<8x1xf32>
    %16 = math.rsqrt %15 : vector<8x1xf32>
    %17 = vector.broadcast %16 : vector<8x1xf32> to vector<8x128xf32>
    %18 = arith.mulf %7, %17 : vector<8x128xf32>
    %19 = arith.mulf %10, %10 : vector<128x128xf32>
    %cst_15 = arith.constant dense<0.000000e+00> : vector<128xf32>
    %20 = vector.multi_reduction <add>, %19, %cst_15 [1] : vector<128x128xf32> to vector<128xf32>
    %21 = vector.shape_cast %20 : vector<128xf32> to vector<128x1xf32>
    %cst_16 = arith.constant 9.99999996E-13 : f32
    %22 = vector.broadcast %cst_16 : f32 to vector<128x1xf32>
    %23 = arith.maximumf %21, %22 : vector<128x1xf32>
    %24 = math.rsqrt %23 : vector<128x1xf32>
    %25 = vector.broadcast %24 : vector<128x1xf32> to vector<128x128xf32>
    %26 = arith.mulf %10, %25 : vector<128x128xf32>
    %cst_17 = arith.constant dense<0.000000e+00> : vector<8x128xf32>
    %27 = tpu.matmul %18, %26, %cst_17 {dimension_numbers = #tpu.dot_dimension_numbers<[1], [1], [0], [0], [0, 0, 1, 0], [], []>} : vector<8x128xf32>, vector<128x128xf32>, vector<8x128xf32> -> vector<8x128xf32>
    %cst_18 = arith.constant 1.000000e+02 : f32
    %28 = vector.broadcast %cst_18 : f32 to vector<8x128xf32>
    %29 = arith.mulf %28, %27 : vector<8x128xf32>
    %30 = tpu.iota {dimensions = array<i32: 1>} : vector<8x128xi32>
    %c3_i32 = arith.constant 3 : i32
    %31 = vector.broadcast %c3_i32 : i32 to vector<8x128xi32>
    %32 = arith.cmpi slt, %30, %31 : vector<8x128xi32>
    %cst_19 = arith.constant -1.000000e+30 : f32
    %33 = vector.broadcast %cst_19 : f32 to vector<8x128xf32>
    %34 = arith.select %32, %29, %33 : vector<8x128xi1>, vector<8x128xf32>
    %cst_20 = arith.constant dense<0xFF800000> : vector<8xf32>
    %35 = vector.multi_reduction <maximumf>, %34, %cst_20 [1] : vector<8x128xf32> to vector<8xf32>
    %36 = vector.shape_cast %35 : vector<8xf32> to vector<8x1xf32>
    %37 = vector.broadcast %36 : vector<8x1xf32> to vector<8x128xf32>
    %38 = arith.subf %34, %37 : vector<8x128xf32>
    %39 = math.exp %38 : vector<8x128xf32>
    %cst_21 = arith.constant dense<0.000000e+00> : vector<8xf32>
    %40 = vector.multi_reduction <add>, %39, %cst_21 [1] : vector<8x128xf32> to vector<8xf32>
    %41 = vector.shape_cast %40 : vector<8xf32> to vector<8x1xf32>
    %42 = tpu.reciprocal %41 {approx = true} : vector<8x1xf32> -> vector<8x1xf32>
    %43 = vector.broadcast %42 : vector<8x1xf32> to vector<8x128xf32>
    %44 = arith.mulf %39, %43 : vector<8x128xf32>
    %c0_22 = arith.constant 0 : index
    %c0_23 = arith.constant 0 : index
    %45 = vector.load %arg7[%c0_22, %c0_23] : memref<8x128xf32, #tpu.memory_space<vmem>>, vector<8x128xf32>
    tpu.vector_store %arg7[%c0_22, %c0_23], %44 {strides = array<i32>} : memref<8x128xf32, #tpu.memory_space<vmem>>, vector<8x128xf32>,
    return
  }
  func.func @transform_0(%arg0: i32) -> (i32, i32) {
    %c0_i32 = arith.constant 0 : i32
    %c0_i32_0 = arith.constant 0 : i32
    return %arg0, %c0_i32 : i32, i32
  }
  func.func @transform_1(%arg0: i32) -> (i32, i32) {
    %c0_i32 = arith.constant 0 : i32
    %c0_i32_0 = arith.constant 0 : i32
    %c0_i32_1 = arith.constant 0 : i32
    return %c0_i32, %c0_i32_0 : i32, i32
  }
  func.func @transform_2(%arg0: i32) -> (i32, i32) {
    %c0_i32 = arith.constant 0 : i32
    %c0_i32_0 = arith.constant 0 : i32
    %c0_i32_1 = arith.constant 0 : i32
    return %c0_i32, %c0_i32_0 : i32, i32
  }
  func.func @transform_3(%arg0: i32) -> (i32, i32) {
    %c0_i32 = arith.constant 0 : i32
    %c0_i32_0 = arith.constant 0 : i32
    %c0_i32_1 = arith.constant 0 : i32
    return %c0_i32, %c0_i32_0 : i32, i32
  }
  func.func @transform_4(%arg0: i32) -> (i32, i32) {
    %c0_i32 = arith.constant 0 : i32
    %c0_i32_0 = arith.constant 0 : i32
    %c0_i32_1 = arith.constant 0 : i32
    return %c0_i32, %c0_i32_0 : i32, i32
  }
  func.func @transform_5(%arg0: i32) -> (i32, i32) {
    %c0_i32 = arith.constant 0 : i32
    %c0_i32_0 = arith.constant 0 : i32
    %c0_i32_1 = arith.constant 0 : i32
    return %c0_i32, %c0_i32_0 : i32, i32
  }
  func.func @transform_6(%arg0: i32) -> (i32, i32) {
    %c0_i32 = arith.constant 0 : i32
    %c0_i32_0 = arith.constant 0 : i32
    return %arg0, %c0_i32 : i32, i32
  }
}

</mosaic_0001>

<bundles_post_ra>
// kernel: _clip_core.1
= control target key start
LH: loop header
LB: loop body
LE: loop exit
PB: predicated region body
PF: predicated region fallthrough
CT: control target
= control target key end

     0   :  { %s1054_s2 = inlined_call_operand.vmem [shape: f32[128,128], index: 2, kind: input, shape index: {}]   ;;  %s1055_s5 = inlined_call_operand.vmem [shape: f32[128,128], index: 5, kind: input, shape index: {}]   ;;  %s1056_s1 = inlined_call_operand.vmem [shape: f32[1,128], index: 1, kind: input, shape index: {}]   ;;  %s1057_s0 = inlined_call_operand.vmem [shape: f32[8,128], index: 0, kind: input, shape index: {}]   ;;  %s1058_s4 = inlined_call_operand.vmem [shape: f32[128,128], index: 4, kind: input, shape index: {}]   ;;  %s1059_s3 = inlined_call_operand.vmem [shape: f32[128,128], index: 3, kind: input, shape index: {}]   ;;  %s1060_s6 = inlined_call_operand.vmem [shape: f32[8,128], index: 6, kind: output, shape index: {}]  }
   0x1   :  { %v39_v0 = vld [vmem:[%s1054_s2 + $0x78] sm:$0xff]  ;;  %v38_v2 = vld [vmem:[%s1054_s2 + $0x70] sm:$0xff]  ;;  %v37_v4 = vld [vmem:[%s1054_s2 + $0x68] sm:$0xff] }
   0x2   :  { %v131_v1 = vld [vmem:[%s1055_s5 + $0x78] sm:$0xff]  ;;  %44 = vmatpush.msra.mxu1 %v39_v0  ;;  %v130_v3 = vld [vmem:[%s1055_s5 + $0x70] sm:$0xff]  ;;  %v129_v5 = vld [vmem:[%s1055_s5 + $0x68] sm:$0xff] }
   0x3   :  { %132 = vmatpush.msra.mxu0 %v131_v1  ;;  %491 = vmatpush.msra.mxu2 %v131_v1  ;;  %v36_v6 = vld [vmem:[%s1054_s2 + $0x60] sm:$0xff]  ;;  %v35_v8 = vld [vmem:[%s1054_s2 + $0x58] sm:$0xff]  ;;  %v34_v10 = vld [vmem:[%s1054_s2 + $0x50] sm:$0xff] }
   0x4   :  { %45 = vmatpush.msra.mxu1 %v38_v2  ;;  %v128_v7 = vld [vmem:[%s1055_s5 + $0x60] sm:$0xff]  ;;  %v127_v9 = vld [vmem:[%s1055_s5 + $0x58] sm:$0xff]  ;;  %v126_v11 = vld [vmem:[%s1055_s5 + $0x50] sm:$0xff] }
   0x5   :  { %133 = vmatpush.msra.mxu0 %v130_v3  ;;  %492 = vmatpush.msra.mxu2 %v130_v3  ;;  %v33_v12 = vld [vmem:[%s1054_s2 + $0x48] sm:$0xff]  ;;  %v32_v14 = vld [vmem:[%s1054_s2 + $0x40] sm:$0xff]  ;;  %v31_v16 = vld [vmem:[%s1054_s2 + $0x38] sm:$0xff] }
   0x6   :  { %46 = vmatpush.msra.mxu1 %v37_v4  ;;  %v125_v13 = vld [vmem:[%s1055_s5 + $0x48] sm:$0xff]  ;;  %v124_v15 = vld [vmem:[%s1055_s5 + $0x40] sm:$0xff]  ;;  %v123_v17 = vld [vmem:[%s1055_s5 + $0x38] sm:$0xff] }
   0x7   :  { %134 = vmatpush.msra.mxu0 %v129_v5  ;;  %493 = vmatpush.msra.mxu2 %v129_v5  ;;  %v30_v18 = vld [vmem:[%s1054_s2 + $0x30] sm:$0xff]  ;;  %v29_v20 = vld [vmem:[%s1054_s2 + $0x28] sm:$0xff]  ;;  %v28_v22 = vld [vmem:[%s1054_s2 + $0x20] sm:$0xff] }
   0x8   :  { %47 = vmatpush.msra.mxu1 %v36_v6  ;;  %v122_v19 = vld [vmem:[%s1055_s5 + $0x30] sm:$0xff]  ;;  %v121_v21 = vld [vmem:[%s1055_s5 + $0x28] sm:$0xff]  ;;  %v120_v23 = vld [vmem:[%s1055_s5 + $0x20] sm:$0xff] }
   0x9   :  { %135 = vmatpush.msra.mxu0 %v128_v7  ;;  %494 = vmatpush.msra.mxu2 %v128_v7  ;;  %v27_v24 = vld [vmem:[%s1054_s2 + $0x18] sm:$0xff]  ;;  %v26_v26 = vld [vmem:[%s1054_s2 + $0x10] sm:$0xff]  ;;  %v25_v28 = vld [vmem:[%s1054_s2 + $0x8] sm:$0xff] }
   0xa   :  { %48 = vmatpush.msra.mxu1 %v35_v8  ;;  %v119_v25 = vld [vmem:[%s1055_s5 + $0x18] sm:$0xff]  ;;  %v118_v27 = vld [vmem:[%s1055_s5 + $0x10] sm:$0xff]  ;;  %v117_v29 = vld [vmem:[%s1055_s5 + $0x8] sm:$0xff] }
   0xb   :  { %136 = vmatpush.msra.mxu0 %v127_v9  ;;  %495 = vmatpush.msra.mxu2 %v127_v9  ;;  %v24_v30 = vld [vmem:[%s1054_s2] sm:$0xff]  ;;  %v109_v34 = vld [vmem:[%s1058_s4 + $0x48] sm:$0xff]  ;;  %v110_v36 = vld [vmem:[%s1058_s4 + $0x50] sm:$0xff] }
   0xc   :  { %49 = vmatpush.msra.mxu1 %v34_v10  ;;  %v116_v31 = vld [vmem:[%s1055_s5] sm:$0xff]  ;;  %v101_v35 = vld [vmem:[%s1058_s4 + $0x8] sm:$0xff]  ;;  %v102_v37 = vld [vmem:[%s1058_s4 + $0x10] sm:$0xff] }
   0xd   :  { %137 = vmatpush.msra.mxu0 %v126_v11  ;;  %496 = vmatpush.msra.mxu2 %v126_v11  ;;  %v23_v32 = vld [vmem:[%s1057_s0] sm:$0xff]  ;;  %v111_v38 = vld [vmem:[%s1058_s4 + $0x58] sm:$0xff]  ;;  %v113_v42 = vld [vmem:[%s1058_s4 + $0x68] sm:$0xff] }
   0xe   :  { %50 = vmatpush.msra.mxu1 %v33_v12  ;;  %v100_v33 = vld [vmem:[%s1058_s4] sm:$0xff]  ;;  %v103_v39 = vld [vmem:[%s1058_s4 + $0x18] sm:$0xff]  ;;  %v78_v44 = vld [vmem:[%s1059_s3 + $0x70] sm:$0xff] }
   0xf   :  { %138 = vmatpush.msra.mxu0 %v125_v13  ;;  %497 = vmatpush.msra.mxu2 %v125_v13  ;;  %v112_v40 = vld [vmem:[%s1058_s4 + $0x60] sm:$0xff]  ;;  %v79_v43 = vld [vmem:[%s1059_s3 + $0x78] sm:$0xff]  ;;  %v77_v45 = vld [vmem:[%s1059_s3 + $0x68] sm:$0xff] }
  0x10   :  { %51 = vmatpush.msra.mxu1 %v32_v14  ;;  %v104_v41 = vld [vmem:[%s1058_s4 + $0x20] sm:$0xff]  ;;  %v105_v47 = vld [vmem:[%s1058_s4 + $0x28] sm:$0xff]  ;;  %v114_v48 = vld [vmem:[%s1058_s4 + $0x70] sm:$0xff] }
  0x11   :  { %139 = vmatpush.msra.mxu0 %v124_v15  ;;  %498 = vmatpush.msra.mxu2 %v124_v15  ;;  %v76_v46 = vld [vmem:[%s1059_s3 + $0x60] sm:$0xff]  ;;  %v75_v49 = vld [vmem:[%s1059_s3 + $0x58] sm:$0xff]  ;;  %v74_v50 = vld [vmem:[%s1059_s3 + $0x50] sm:$0xff] }
  0x12   :  { %52 = vmatpush.msra.mxu1 %v31_v16  ;;  %v73_v51 = vld [vmem:[%s1059_s3 + $0x48] sm:$0xff]  ;;  %v72_v52 = vld [vmem:[%s1059_s3 + $0x40] sm:$0xff]  ;;  %v106_v53 = vld [vmem:[%s1058_s4 + $0x30] sm:$0xff] }
  0x13   :  { %140 = vmatpush.msra.mxu0 %v123_v17  ;;  %499 = vmatpush.msra.mxu2 %v123_v17  ;;  %v115_v54 = vld [vmem:[%s1058_s4 + $0x78] sm:$0xff]  ;;  %v70_v56 = vld [vmem:[%s1059_s3 + $0x30] sm:$0xff]  ;;  %v69_v57 = vld [vmem:[%s1059_s3 + $0x28] sm:$0xff] }
  0x14   :  { %53 = vmatpush.msra.mxu1 %v30_v18  ;;  %v71_v55 = vld [vmem:[%s1059_s3 + $0x38] sm:$0xff]  ;;  %v68_v58 = vld [vmem:[%s1059_s3 + $0x20] sm:$0xff]  ;;  %v66_v61 = vld [vmem:[%s1059_s3 + $0x10] sm:$0xff] }
  0x15   :  { %141 = vmatpush.msra.mxu0 %v122_v19  ;;  %500 = vmatpush.msra.mxu2 %v122_v19  ;;  %v107_v59 = vld [vmem:[%s1058_s4 + $0x38] sm:$0xff]  ;;  %v108_v62 = vld [vmem:[%s1058_s4 + $0x40] sm:$0xff]  ;;  %v65_v63 = vld [vmem:[%s1059_s3 + $0x8] sm:$0xff] }
  0x16   :  { %54 = vmatpush.msra.mxu1 %v29_v20  ;;  %v67_v60 = vld [vmem:[%s1059_s3 + $0x18] sm:$0xff]  ;;  %v64_v0 = vld [vmem:[%s1059_s3] sm:$0xff] }
  0x17   :  { %142 = vmatpush.msra.mxu0 %v121_v21  ;;  %501 = vmatpush.msra.mxu2 %v121_v21  ;;  %v507_v1 = vld [vmem:[%s1056_s1] ss:$0 sm:$0xff] }
  0x18   :  { %55 = vmatpush.msra.mxu1 %v28_v22 }
  0x19   :  { %143 = vmatpush.msra.mxu0 %v120_v23  ;;  %502 = vmatpush.msra.mxu2 %v120_v23 }
  0x1a   :  { %56 = vmatpush.msra.mxu1 %v27_v24 }
  0x1b   :  { %144 = vmatpush.msra.mxu0 %v119_v25  ;;  %503 = vmatpush.msra.mxu2 %v119_v25 }
  0x1c   :  { %57 = vmatpush.msra.mxu1 %v26_v26 }
  0x1d   :  { %145 = vmatpush.msra.mxu0 %v118_v27  ;;  %504 = vmatpush.msra.mxu2 %v118_v27 }
  0x1e   :  { %58 = vmatpush.msra.mxu1 %v25_v28 }
  0x1f   :  { %146 = vmatpush.msra.mxu0 %v117_v29  ;;  %505 = vmatpush.msra.mxu2 %v117_v29 }
  0x20   :  { %59 = vmatpush.msra.mxu1 %v24_v30 }
  0x21   :  { %147 = vmatpush.msra.mxu0 %v116_v31  ;;  %506 = vmatpush.msra.mxu2 %v116_v31 }
  0x22   :  { %60 = vmatmul.f32.vlgmr.msra.gmra.mxu1 %v23_v32  ;;  %148 = vmatmul.f32.vlgmr.msra.gmra.mxu0 %v100_v33 }
  0x23   :  { %175 = vmatmul.f32.vlgmr.msra.gmra.mxu2 %v109_v34  ;;  %80 = vmatpush.msrb.mxu1 %v79_v43 }
  0x25   :  { %81 = vmatpush.msrb.mxu1 %v78_v44 }
  0x27   :  { %82 = vmatpush.msrb.mxu1 %v77_v45 }
  0x29   :  { %83 = vmatpush.msrb.mxu1 %v76_v46 }
  0x2a   :  { %151 = vmatmul.f32.gmra.mxu0 %v101_v35 }
  0x2b   :  { %178 = vmatmul.f32.gmra.mxu2 %v110_v36  ;;  %84 = vmatpush.msrb.mxu1 %v75_v49 }
  0x2d   :  { %85 = vmatpush.msrb.mxu1 %v74_v50 }
  0x2f   :  { %86 = vmatpush.msrb.mxu1 %v73_v51 }
  0x31   :  { %87 = vmatpush.msrb.mxu1 %v72_v52 }
  0x32   :  { %154 = vmatmul.f32.gmra.mxu0 %v102_v37 }
  0x33   :  { %181 = vmatmul.f32.gmra.mxu2 %v111_v38  ;;  %88 = vmatpush.msrb.mxu1 %v71_v55 }
  0x35   :  { %89 = vmatpush.msrb.mxu1 %v70_v56 }
  0x37   :  { %90 = vmatpush.msrb.mxu1 %v69_v57 }
  0x39   :  { %91 = vmatpush.msrb.mxu1 %v68_v58 }
  0x3a   :  { %157 = vmatmul.f32.gmra.mxu0 %v103_v39 }
  0x3b   :  { %184 = vmatmul.f32.gmra.mxu2 %v112_v40  ;;  %92 = vmatpush.msrb.mxu1 %v67_v60 }
  0x3d   :  { %93 = vmatpush.msrb.mxu1 %v66_v61 }
  0x3f   :  { %94 = vmatpush.msrb.mxu1 %v65_v63 }
  0x41   :  { %95 = vmatpush.msrb.mxu1 %v64_v0 }
  0x42   :  { %160 = vmatmul.f32.gmra.mxu0 %v104_v41 }
  0x43   :  { %187 = vmatmul.f32.gmra.mxu2 %v113_v42 }
  0x4a   :  { %163 = vmatmul.f32.gmra.mxu0 %v105_v47 }
  0x4b   :  { %190 = vmatmul.f32.gmra.mxu2 %v114_v48 }
  0x52   :  { %166 = vmatmul.f32.gmra.mxu0 %v106_v53 }
  0x53   :  { %193 = vmatmul.f32.gmra.mxu2 %v115_v54 }
  0x5a   :  { %169 = vmatmul.f32.gmra.mxu0 %v107_v59 }
  0x62   :  { %172 = vmatmul.f32.gmra.mxu0 %v108_v62 }
  0x9f   :  { %v61_v2 = vpop.f32.mrf.mxu1  ;;  %v779_v4 = vpop.f32.mrf.mxu0 }
  0xa0   :  { %v62_v3 = vadd.f32 %v507_v1, %v61_v2  ;;  %v212_v35 = vmul.f32 %v779_v4, %v779_v4 }
  0xa2   :  { %96 = vmatmul.f32.vlgmr.msrb.gmra.mxu1 %v62_v3 }
  0xa6   :  { %v781_v5 = vpop.f32.mrf.mxu2 }
  0xa7   :  { %v783_v6 = vpop.f32.mrf.mxu0  ;;  %v221_v29 = vmul.f32 %v781_v5, %v781_v5 }
  0xa8   :  { %v213_v30 = vmul.f32 %v783_v6, %v783_v6 }
  0xae   :  { %v785_v7 = vpop.f32.mrf.mxu2 }
  0xaf   :  { %v787_v8 = vpop.f32.mrf.mxu0  ;;  %v222_v13 = vmul.f32 %v785_v7, %v785_v7 }
  0xb0   :  { %v214_v33 = vmul.f32 %v787_v8, %v787_v8 }
  0xb6   :  { %v789_v9 = vpop.f32.mrf.mxu2 }
  0xb7   :  { %v223_v10 = vmul.f32 %v789_v9, %v789_v9  ;;  %v793_v11 = vpop.f32.mrf.mxu0 }
  0xb8   :  { %v215_v34 = vmul.f32 %v793_v11, %v793_v11 }
  0xb9   :  { %250 = vadd.xlane.f32.xlu2 %v223_v10 }
  0xbe   :  { %v795_v12 = vpop.f32.mrf.mxu2 }
  0xbf   :  { %v799_v14 = vpop.f32.mrf.mxu0  ;;  %v224_v19 = vmul.f32 %v795_v12, %v795_v12 }
  0xc0   :  { %v216_v28 = vmul.f32 %v799_v14, %v799_v14 }
  0xc1   :  { %248 = vadd.xlane.f32.xlu2 %v222_v13 }
  0xc6   :  { %v801_v15 = vpop.f32.mrf.mxu2 }
  0xc7   :  { %v225_v16 = vmul.f32 %v801_v15, %v801_v15  ;;  %v805_v17 = vpop.f32.mrf.mxu0 }
  0xc8   :  { %v217_v31 = vmul.f32 %v805_v17, %v805_v17 }
  0xc9   :  { %254 = vadd.xlane.f32.xlu1 %v225_v16 }
  0xce   :  { %v807_v18 = vpop.f32.mrf.mxu2 }
  0xcf   :  { %v811_v20 = vpop.f32.mrf.mxu0  ;;  %v226_v25 = vmul.f32 %v807_v18, %v807_v18 }
  0xd0   :  { %v218_v32 = vmul.f32 %v811_v20, %v811_v20 }
  0xd1   :  { %252 = vadd.xlane.f32.xlu1 %v224_v19 }
  0xd6   :  { %v813_v21 = vpop.f32.mrf.mxu2 }
  0xd7   :  { %v227_v22 = vmul.f32 %v813_v21, %v813_v21  ;;  %v817_v23 = vpop.f32.mrf.mxu0 }
  0xd8   :  { %v219_v24 = vmul.f32 %v817_v23, %v817_v23 }
  0xd9   :  { %258 = vadd.xlane.f32.xlu0 %v227_v22 }
  0xda   :  { %242 = vadd.xlane.f32.xlu2 %v219_v24 }
  0xdf   :  { %v823_v26 = vpop.f32.mrf.mxu0 }
  0xe0   :  { %v220_v27 = vmul.f32 %v823_v26, %v823_v26 }
  0xe1   :  { %256 = vadd.xlane.f32.xlu0 %v226_v25 }
  0xe2   :  { %236 = vadd.xlane.f32.xlu2 %v216_v28  ;;  %244 = vadd.xlane.f32.xlu1 %v220_v27 }
  0xe9   :  { %246 = vadd.xlane.f32.xlu0 %v221_v29 }
  0xea   :  { %230 = vadd.xlane.f32.xlu2 %v213_v30  ;;  %238 = vadd.xlane.f32.xlu1 %v217_v31 }
  0xf1   :  { %240 = vadd.xlane.f32.xlu0 %v218_v32 }
  0xf2   :  { %232 = vadd.xlane.f32.xlu1 %v214_v33 }
  0xf9   :  { %234 = vadd.xlane.f32.xlu0 %v215_v34 }
 0x101   :  { %228 = vadd.xlane.f32.xlu0 %v212_v35 }
 0x11f   :  { %v843_v36 = vpop.f32.mrf.mxu1 }
 0x120   :  { %v197_v37 = vmul.f32 %v843_v36, %v843_v36 }
 0x122   :  { %198 = vadd.xlane.f32.xlu1 %v197_v37 }
 0x12c   :  { %v251_v39 = vpop.xlane.xlu2 %250 }
 0x12d   :  { %v852_v45 = vmax.f32 %v251_v39, 1e-12 }
 0x12f   :  { %vm392_vm11 = vweird.f32 %v852_v45 }
 0x134   :  { %v249_v46 = vpop.xlane.xlu2 %248 }
 0x135   :  { %v857_v48 = vmax.f32 %v249_v46, 1e-12 }
 0x137   :  { %vm382_vm15 = vweird.f32 %v857_v48 }
 0x13c   :  { %v255_v38 = vpop.xlane.xlu1 %254 }
 0x13d   :  { %v847_v40 = vmax.f32 %v255_v38, 1e-12 }
 0x13f   :  { %508 = vrsqrt.f32 %v847_v40  ;;  %vm412_vm4 = vweird.f32 %v847_v40 }
 0x144   :  { %v253_v41 = vpop.xlane.xlu1 %252 }
 0x145   :  { %v850_v43 = vmax.f32 %v253_v41, 1e-12  ;;  %v855_v47 = vpop.eup %508 }
 0x146   :  { %v407_v51 = vmul.f32 %v855_v47, %v847_v40  ;;  %vm413_vm5 = vweird.f32 %v855_v47 }
 0x147   :  { %vm414_vm8 = vmor %vm412_vm4, %vm413_vm5  ;;  %vm402_vm10 = vweird.f32 %v850_v43 }
 0x148   :  { %v408_v57 = vmul.f32 %v855_v47, %v407_v51 }
 0x14a   :  { %v409_v3 = vmul.f32 0.5, %v408_v57 }
 0x14c   :  { %v259_v42 = vpop.xlane.xlu0 %258  ;;  %v410_v30 = vsub.f32 1.5, %v409_v3 }
 0x14d   :  { %v275_v44 = vmax.f32 %v259_v42, 1e-12  ;;  %v243_v63 = vpop.xlane.xlu2 %242 }
 0x14e   :  { %v879_v24 = vmax.f32 %v243_v63, 1e-12  ;;  %v411_v42 = vmul.f32 %v855_v47, %v410_v30 }
 0x14f   :  { %510 = vrsqrt.f32 %v275_v44  ;;  %vm432_vm0 = vweird.f32 %v275_v44 }
 0x150   :  { %512 = vrsqrt.f32 %v850_v43  ;;  %v415_v63 = vsel %vm414_vm8, %v855_v47, %v411_v42 }
 0x151   :  { %514 = vrsqrt.f32 %v852_v45 }
 0x152   :  { %516 = vrsqrt.f32 %v857_v48 }
 0x154   :  { %v257_v49 = vpop.xlane.xlu0 %256 }
 0x155   :  { %v511_v50 = vpop.eup %510  ;;  %v274_v52 = vmax.f32 %v257_v49, 1e-12  ;;  %v245_v60 = vpop.xlane.xlu1 %244 }
 0x156   :  { %v427_v53 = vmul.f32 %v511_v50, %v275_v44  ;;  %v863_v54 = vpop.eup %512  ;;  %vm433_vm1 = vweird.f32 %v511_v50  ;;  %v874_v10 = vmax.f32 %v245_v60, 1e-12 }
 0x157   :  { %518 = vrsqrt.f32 %v274_v52  ;;  %v865_v56 = vpop.eup %514  ;;  %v397_v58 = vmul.f32 %v863_v54, %v850_v43  ;;  %vm434_vm2 = vmor %vm432_vm0, %vm433_vm1  ;;  %vm422_vm6 = vweird.f32 %v274_v52  ;;  %vm403_vm9 = vweird.f32 %v863_v54 }
 0x158   :  { %v428_v55 = vmul.f32 %v511_v50, %v427_v53  ;;  %v870_v61 = vpop.eup %516  ;;  %v387_v62 = vmul.f32 %v865_v56, %v852_v45  ;;  %vm404_vm12 = vmor %vm402_vm10, %vm403_vm9  ;;  %vm393_vm13 = vweird.f32 %v865_v56 }
 0x159   :  { %v398_v16 = vmul.f32 %v863_v54, %v397_v58  ;;  %v377_v27 = vmul.f32 %v870_v61, %v857_v48  ;;  %v237_v58 = vpop.xlane.xlu2 %236  ;;  %vm383_vm14 = vweird.f32 %v870_v61  ;;  %vm394_vm0 = vmor %vm392_vm11, %vm393_vm13 }
 0x15a   :  { %v429_v59 = vmul.f32 0.5, %v428_v55  ;;  %v388_v25 = vmul.f32 %v865_v56, %v387_v62  ;;  %v919_v40 = vmax.f32 %v237_v58, 1e-12  ;;  %vm384_vm1 = vmor %vm382_vm15, %vm383_vm14 }
 0x15b   :  { %v399_v31 = vmul.f32 0.5, %v398_v16  ;;  %v378_v35 = vmul.f32 %v870_v61, %v377_v27 }
 0x15c   :  { %v247_v0 = vpop.xlane.xlu0 %246  ;;  %v430_v1 = vsub.f32 1.5, %v429_v59  ;;  %v389_v34 = vmul.f32 0.5, %v388_v25 }
 0x15d   :  { %v519_v2 = vpop.eup %518  ;;  %v876_v13 = vmax.f32 %v247_v0, 1e-12  ;;  %v239_v46 = vpop.xlane.xlu1 %238  ;;  %v379_v53 = vmul.f32 0.5, %v378_v35 }
 0x15e   :  { %v417_v19 = vmul.f32 %v519_v2, %v274_v52  ;;  %v431_v22 = vmul.f32 %v511_v50, %v430_v1  ;;  %vm423_vm3 = vweird.f32 %v519_v2  ;;  %v390_v51 = vsub.f32 1.5, %v389_v34 }
 0x15f   :  { %520 = vrsqrt.f32 %v876_v13  ;;  %vm424_vm7 = vmor %vm422_vm6, %vm423_vm3  ;;  %v902_v59 = vmax.f32 %v239_v46, 1e-12  ;;  %v380_v1 = vsub.f32 1.5, %v379_v53  ;;  %vm362_vm3 = vweird.f32 %v874_v10 }
 0x160   :  { %v418_v28 = vmul.f32 %v519_v2, %v417_v19  ;;  %v435_v29 = vsel %vm434_vm2, %v511_v50, %v431_v22  ;;  %522 = vrsqrt.f32 %v874_v10  ;;  %v391_v19 = vmul.f32 %v865_v56, %v390_v51 }
 0x161   :  { %v451_v33 = vmul.f32 %v435_v29, %v813_v21  ;;  %524 = vrsqrt.f32 %v879_v24  ;;  %v400_v21 = vsub.f32 1.5, %v399_v31  ;;  %v231_v34 = vpop.xlane.xlu2 %230  ;;  %vm372_vm4 = vweird.f32 %v876_v13 }
 0x162   :  { %v419_v32 = vmul.f32 0.5, %v418_v28  ;;  %vm352_vm6 = vweird.f32 %v879_v24  ;;  %vm332_vm15 = vweird.f32 %v902_v59 }
 0x163   :  { %452 = vmatpush.xpose.msra.mxu3 %v451_v33  ;;  %v401_v0 = vmul.f32 %v863_v54, %v400_v21 }
 0x164   :  { %v420_v37 = vsub.f32 1.5, %v419_v32  ;;  %v241_v38 = vpop.xlane.xlu0 %240  ;;  %v395_v32 = vsel %vm394_vm0, %v865_v56, %v391_v19 }
 0x165   :  { %v889_v39 = vpop.eup %520  ;;  %v892_v41 = vmax.f32 %v241_v38, 1e-12  ;;  %v405_v43 = vsel %vm404_vm12, %v863_v54, %v401_v0  ;;  %v233_v31 = vpop.xlane.xlu1 %232  ;;  %v447_v45 = vmul.f32 %v395_v32, %v789_v9  ;;  %v962_v9 = vmax.f32 %v231_v34, 1e-12 }
 0x166   :  { %v367_v44 = vmul.f32 %v889_v39, %v876_v13  ;;  %v421_v49 = vmul.f32 %v519_v2, %v420_v37  ;;  %v898_v50 = vpop.eup %522  ;;  %v448_v28 = vmul.f32 %v405_v43, %v795_v12  ;;  %v948_v35 = vmax.f32 %v233_v31, 1e-12 }
 0x167   :  { %v900_v57 = vpop.eup %524  ;;  %526 = vrsqrt.f32 %v892_v41  ;;  %v357_v60 = vmul.f32 %v898_v50, %v874_v10  ;;  %vm373_vm2 = vweird.f32 %v889_v39  ;;  %vm363_vm5 = vweird.f32 %v898_v50 }
 0x168   :  { %v425_v55 = vsel %vm424_vm7, %v519_v2, %v421_v49  ;;  %v368_v62 = vmul.f32 %v889_v39, %v367_v44  ;;  %528 = vrsqrt.f32 %v902_v59  ;;  %v449_v2 = vmul.f32 %v415_v63, %v801_v15  ;;  %vm374_vm7 = vmor %vm372_vm4, %vm373_vm2 }
 0x169   :  { %v450_v52 = vmul.f32 %v425_v55, %v807_v18  ;;  %v347_v18 = vmul.f32 %v900_v57, %v879_v24  ;;  %v358_v47 = vmul.f32 %v898_v50, %v357_v60  ;;  %530 = vrsqrt.f32 %v919_v40  ;;  %vm979_vm9 = vmor %vm362_vm3, %vm363_vm5 }
 0x16a   :  { %v369_v3 = vmul.f32 0.5, %v368_v62  ;;  %v381_v15 = vmul.f32 %v870_v61, %v380_v1  ;;  %vm353_vm8 = vweird.f32 %v900_v57  ;;  %vm342_vm12 = vweird.f32 %v892_v41 }
 0x16b   :  { %453 = vmatpush.xpose.msra.mxu3 %v450_v52  ;;  %v348_v25 = vmul.f32 %v900_v57, %v347_v18  ;;  %v359_v54 = vmul.f32 0.5, %v358_v47  ;;  %vm991_vm10 = vmor %vm352_vm6, %vm353_vm8  ;;  %vm322_vm2 = vweird.f32 %v919_v40  ;;  %vm302_vm8 = vweird.f32 %v948_v35 }
 0x16c   :  { %v235_v16 = vpop.xlane.xlu0 %234  ;;  %v370_v29 = vsub.f32 1.5, %v369_v3  ;;  %v385_v12 = vsel %vm384_vm1, %v870_v61, %v381_v15 }
 0x16d   :  { %v928_v22 = vpop.eup %526  ;;  %v935_v27 = vmax.f32 %v235_v16, 1e-12  ;;  %v349_v48 = vmul.f32 0.5, %v348_v25  ;;  %v360_v38 = vsub.f32 1.5, %v359_v54  ;;  %v446_v61 = vmul.f32 %v385_v12, %v785_v7 }
 0x16e   :  { %v337_v30 = vmul.f32 %v928_v22, %v892_v41  ;;  %v945_v33 = vpop.eup %528  ;;  %v371_v21 = vmul.f32 %v889_v39, %v370_v29  ;;  %vm343_vm11 = vweird.f32 %v928_v22 }
 0x16f   :  { %454 = vmatpush.xpose.msra.mxu3 %v449_v2  ;;  %532 = vrsqrt.f32 %v935_v27  ;;  %v953_v37 = vpop.eup %530  ;;  %v327_v56 = vmul.f32 %v945_v33, %v902_v59  ;;  %v350_v44 = vsub.f32 1.5, %v349_v48  ;;  %v361_v53 = vmul.f32 %v898_v50, %v360_v38  ;;  %vm344_vm13 = vmor %vm342_vm12, %vm343_vm11 }
 0x170   :  { %v338_v42 = vmul.f32 %v928_v22, %v337_v30  ;;  %v317_v46 = vmul.f32 %v953_v37, %v919_v40  ;;  %534 = vrsqrt.f32 %v948_v35  ;;  %v375_v51 = vsel %vm374_vm7, %v889_v39, %v371_v21 }
 0x171   :  { %v328_v7 = vmul.f32 %v945_v33, %v327_v56  ;;  %536 = vrsqrt.f32 %v962_v9  ;;  %v351_v52 = vmul.f32 %v900_v57, %v350_v44  ;;  %v445_v39 = vmul.f32 %v375_v51, %v781_v5 }
 0x172   :  { %v339_v49 = vmul.f32 0.5, %v338_v42  ;;  %v318_v60 = vmul.f32 %v953_v37, %v317_v46  ;;  %v365_v18 = vsel %vm979_vm9, %v898_v50, %v361_v53  ;;  %vm333_vm14 = vweird.f32 %v945_v33 }
 0x173   :  { %455 = vmatpush.xpose.msra.mxu3 %v448_v28  ;;  %v329_v10 = vmul.f32 0.5, %v328_v7  ;;  %v355_v5 = vsel %vm991_vm10, %v900_v57, %v351_v52  ;;  %v444_v47 = vmul.f32 %v365_v18, %v823_v26  ;;  %vm334_vm0 = vmor %vm332_vm15, %vm333_vm14  ;;  %vm323_vm1 = vweird.f32 %v953_v37 }
 0x174   :  { %v229_v13 = vpop.xlane.xlu0 %228  ;;  %v340_v0 = vsub.f32 1.5, %v339_v49  ;;  %v319_v24 = vmul.f32 0.5, %v318_v60  ;;  %v443_v26 = vmul.f32 %v355_v5, %v817_v23  ;;  %vm324_vm3 = vmor %vm322_vm2, %vm323_vm1  ;;  %vm312_vm5 = vweird.f32 %v935_v27 }
 0x175   :  { %v975_v55 = vpop.eup %532  ;;  %v986_v62 = vmax.f32 %v229_v13, 1e-12  ;;  %v330_v16 = vsub.f32 1.5, %v329_v10  ;;  %vm292_vm11 = vweird.f32 %v962_v9 }
 0x176   :  { %v307_v1 = vmul.f32 %v975_v55, %v935_v27  ;;  %v1000_v2 = vpop.eup %534  ;;  %v341_v19 = vmul.f32 %v928_v22, %v340_v0  ;;  %v320_v57 = vsub.f32 1.5, %v319_v24  ;;  %vm313_vm4 = vweird.f32 %v975_v55 }
 0x177   :  { %456 = vmatpush.xpose.msra.mxu3 %v447_v45  ;;  %538 = vrsqrt.f32 %v986_v62  ;;  %v1008_v3 = vpop.eup %536  ;;  %v297_v50 = vmul.f32 %v1000_v2, %v948_v35  ;;  %v331_v29 = vmul.f32 %v945_v33, %v330_v16  ;;  %vm314_vm6 = vmor %vm312_vm5, %vm313_vm4  ;;  %vm303_vm7 = vweird.f32 %v1000_v2 }
 0x178   :  { %v308_v43 = vmul.f32 %v975_v55, %v307_v1  ;;  %v287_v25 = vmul.f32 %v1008_v3, %v962_v9  ;;  %v345_v54 = vsel %vm344_vm13, %v928_v22, %v341_v19  ;;  %v321_v23 = vmul.f32 %v953_v37, %v320_v57  ;;  %vm304_vm9 = vmor %vm302_vm8, %vm303_vm7 }
 0x179   :  { %v298_v15 = vmul.f32 %v1000_v2, %v297_v50  ;;  %v442_v31 = vmul.f32 %v345_v54, %v811_v20  ;;  %v335_v22 = vsel %vm334_vm0, %v945_v33, %v331_v29  ;;  %vm293_vm10 = vweird.f32 %v1008_v3 }
 0x17a   :  { %v309_v28 = vmul.f32 0.5, %v308_v43  ;;  %v288_v41 = vmul.f32 %v1008_v3, %v287_v25  ;;  %v441_v34 = vmul.f32 %v335_v22, %v805_v17  ;;  %v325_v20 = vsel %vm324_vm3, %v953_v37, %v321_v23  ;;  %vm294_vm12 = vmor %vm292_vm11, %vm293_vm10 }
 0x17b   :  { %457 = vmatpush.xpose.msra.mxu3 %v446_v61  ;;  %v299_v32 = vmul.f32 0.5, %v298_v15  ;;  %v440_v33 = vmul.f32 %v325_v20, %v799_v14  ;;  %vm282_vm14 = vweird.f32 %v986_v62 }
 0x17c   :  { %v310_v48 = vsub.f32 1.5, %v309_v28  ;;  %v289_v59 = vmul.f32 0.5, %v288_v41 }
 0x17d   :  { %v539_v30 = vpop.eup %538  ;;  %v300_v45 = vsub.f32 1.5, %v299_v32 }
 0x17e   :  { %v277_v12 = vmul.f32 %v539_v30, %v986_v62  ;;  %v311_v56 = vmul.f32 %v975_v55, %v310_v48  ;;  %v290_v42 = vsub.f32 1.5, %v289_v59  ;;  %vm283_vm13 = vweird.f32 %v539_v30 }
 0x17f   :  { %458 = vmatpush.xpose.msra.mxu3 %v445_v39  ;;  %v301_v17 = vmul.f32 %v1000_v2, %v300_v45  ;;  %vm284_vm15 = vmor %vm282_vm14, %vm283_vm13 }
 0x180   :  { %v278_v38 = vmul.f32 %v539_v30, %v277_v12  ;;  %v315_v21 = vsel %vm314_vm6, %v975_v55, %v311_v56  ;;  %v291_v46 = vmul.f32 %v1008_v3, %v290_v42 }
 0x181   :  { %v439_v61 = vmul.f32 %v315_v21, %v793_v11  ;;  %v305_v14 = vsel %vm304_vm9, %v1000_v2, %v301_v17 }
 0x182   :  { %v279_v40 = vmul.f32 0.5, %v278_v38  ;;  %v438_v7 = vmul.f32 %v305_v14, %v787_v8  ;;  %v295_v35 = vsel %vm294_vm12, %v1008_v3, %v291_v46 }
 0x183   :  { %459 = vmatpush.xpose.msra.mxu3 %v444_v47  ;;  %v437_v11 = vmul.f32 %v295_v35, %v783_v6  ;;  %v473_v6 = vlaneseq }
 0x184   :  { %v280_v27 = vsub.f32 1.5, %v279_v40 }
 0x185   :  { %v474_v39 = vand.u32 127, %v473_v6 }
 0x186   :  { %v281_v49 = vmul.f32 %v539_v30, %v280_v27 }
 0x187   :  { %460 = vmatpush.xpose.msra.mxu3 %v443_v26  ;;  %vm475_vm3 = vcmp.lt.s32.totalorder %v474_v39, 3 }
 0x188   :  { %v285_v51 = vsel %vm284_vm15, %v539_v30, %v281_v49 }
 0x189   :  { %v436_v9 = vmul.f32 %v285_v51, %v779_v4 }
 0x18b   :  { %461 = vmatpush.xpose.msra.mxu3 %v442_v31 }
 0x18f   :  { %462 = vmatpush.xpose.msra.mxu3 %v441_v34 }
 0x193   :  { %463 = vmatpush.xpose.msra.mxu3 %v440_v33 }
 0x195   :  { %v199_v37 = vpop.xlane.xlu1 %198 }
 0x196   :  { %v200_v44 = vmax.f32 %v199_v37, 1e-12 }
 0x197   :  { %464 = vmatpush.xpose.msra.mxu3 %v439_v61 }
 0x198   :  { %540 = vrsqrt.f32 %v200_v44  ;;  %vm207_vm1 = vweird.f32 %v200_v44 }
 0x19b   :  { %465 = vmatpush.xpose.msra.mxu3 %v438_v7 }
 0x19e   :  { %v541_v13 = vpop.eup %540 }
 0x19f   :  { %v202_v53 = vmul.f32 %v541_v13, %v200_v44  ;;  %466 = vmatpush.xpose.msra.mxu3 %v437_v11  ;;  %vm208_vm0 = vweird.f32 %v541_v13 }
 0x1a0   :  { %vm209_vm2 = vmor %vm207_vm1, %vm208_vm0 }
 0x1a1   :  { %v203_v55 = vmul.f32 %v541_v13, %v202_v53 }
 0x1a3   :  { %v204_v58 = vmul.f32 0.5, %v203_v55  ;;  %467 = vmatpush.xpose.msra.mxu3 %v436_v9 }
 0x1a5   :  { %v205_v8 = vsub.f32 1.5, %v204_v58 }
 0x1a7   :  { %v206_v52 = vmul.f32 %v541_v13, %v205_v8 }
 0x1a9   :  { %v210_v60 = vsel %vm209_vm2, %v541_v13, %v206_v52 }
 0x1aa   :  { %v211_v62 = vmul.f32 %v210_v60, %v843_v36 }
 0x1ac   :  { %468 = vmatmul.f32.vlgmr.msra.gmra.mxu3 %v211_v62 }
 0x22f   :  { %v469_v63 = vpop.f32.mrf.mxu3 }
 0x230   :  { %v472_v10 = vmul.f32 100.0, %v469_v63 }
 0x232   :  { %v476_v0 = vsel %vm475_vm3, %v472_v10, -1e+30 }
 0x233   :  { %477 = vmax.xlane.f32.xlu2 %v476_v0 }
 0x2a6   :  { %v478_v1 = vpop.xlane.xlu2 %477 }
 0x2a7   :  { %v479_v4 = vsub.f32 %v476_v0, %v478_v1 }
 0x2a9   :  { %v480_v18 = vmul.f32 1.442695, %v479_v4 }
 0x2ab   :  { %542 = vpow2.f32 %v480_v18 }
 0x2b1   :  { %v543_v2 = vpop.eup %542 }
 0x2b2   :  { %482 = vadd.xlane.f32.xlu0 %v543_v2 }
 0x325   :  { %v483_v5 = vpop.xlane.xlu0 %482 }
 0x326   :  { %544 = vrcp.f32 %v483_v5 }
 0x32c   :  { %v545_v24 = vpop.eup %544 }
 0x32d   :  { %v485_v47 = vmul.f32 %v545_v24, %v543_v2 }
 0x32f   :  { %486 = vst [vmem:[%s1060_s6] sm:$0xff] %v485_v47 }

</bundles_post_ra>
